<compile_context>
chip_gen: v7x
topology: tpu7x:2x2x1
jax: 0.10.0
libtpu: 0.0.40
codegen_flags: <defaults>
</compile_context>

<pallas_src>
import jax
import jax.numpy as jnp
from jax.experimental import pallas as pl
from jax.experimental.pallas import tpu as pltpu

IN_FEATURES = 32   # stands in for x_train.shape[1]
H1 = 42
H2 = 21
OUT = 1


def _round_up(n, m):
    return ((n + m - 1) // m) * m


def mlp_kernel(x_ref, w1_ref, b1_ref, w2_ref, b2_ref, w3_ref, b3_ref, o_ref):
    # x_ref: (F_pad, tile) -- batch on the lane axis.
    x = x_ref[...]
    h1 = jnp.maximum(
        jnp.dot(w1_ref[...], x, preferred_element_type=jnp.float32) + b1_ref[...], 0.0)
    h2 = jnp.maximum(
        jnp.dot(w2_ref[...], h1, preferred_element_type=jnp.float32) + b2_ref[...], 0.0)
    # Padded third matmul: (O_pad, H2_pad) @ (H2_pad, tile); only row 0 is real.
    z = jnp.dot(w3_ref[...], h2, preferred_element_type=jnp.float32) + b3_ref[...]
    z0 = z[0:1, :]                                  # (1, tile), lane-dense
    o_ref[...] = 1.0 / (1.0 + jnp.exp(-z0))         # exp on EUP; tiny exact divide


def neural_net_forward(x, params, *, batch_tile=512):
    """x: (B, in_features) f32.  params: PyTorch-layout (out, in) weights, (out,) biases."""
    w1, b1, w2, b2, w3, b3 = params
    B, F = x.shape

    F_pad = _round_up(F, 8)
    H1_pad = _round_up(w1.shape[0], 8)
    H2_pad = _round_up(w2.shape[0], 8)
    O_pad = _round_up(w3.shape[0], 8)

    batch_tile = max(128, _round_up(batch_tile, 128))   # lane-multiple tiles
    B_pad = _round_up(B, batch_tile)
    nb = B_pad // batch_tile

    # Transpose + zero-pad the input so batch is on the 128-lane axis.
    xt = jnp.zeros((F_pad, B_pad), jnp.float32).at[:F, :B].set(x.T)

    pad2 = lambda a, r, c: jnp.zeros((r, c), jnp.float32).at[:a.shape[0], :a.shape[1]].set(a)
    w1p = pad2(w1, H1_pad, F_pad)
    w2p = pad2(w2, H2_pad, H1_pad)
    w3p = pad2(w3, O_pad, H2_pad)
    b1p = pad2(b1.reshape(-1, 1), H1_pad, 1)
    b2p = pad2(b2.reshape(-1, 1), H2_pad, 1)
    b3p = pad2(b3.reshape(-1, 1), O_pad, 1)

    # Full-array blocks with constant index_map: weights stay resident in VMEM.
    full = lambda a: pl.BlockSpec(a.shape, lambda i: (0, 0))

    out_t = pl.pallas_call(
        mlp_kernel,
        out_shape=jax.ShapeDtypeStruct((1, B_pad), jnp.float32),
        grid_spec=pltpu.PrefetchScalarGridSpec(
            num_scalar_prefetch=0,
            grid=(nb,),
            in_specs=[
                pl.BlockSpec((F_pad, batch_tile), lambda i: (0, i)),
                full(w1p), full(b1p),
                full(w2p), full(b2p),
                full(w3p), full(b3p),
            ],
            out_specs=pl.BlockSpec((1, batch_tile), lambda i: (0, i)),
        ),
        compiler_params=pltpu.CompilerParams(
            dimension_semantics=("parallel",),   # shards grid steps across v7x's 2 TCs
        ),
    )(xt, w1p, b1p, w2p, b2p, w3p, b3p)

    return out_t[0, :B].reshape(B, 1)


def init_params(key):
    # Mimics torch.nn.Linear default init: U(-1/sqrt(fan_in), 1/sqrt(fan_in)),
    # weights kept in PyTorch (out_features, in_features) layout.
    def linear(key, fan_in, fan_out):
        kw, kb = jax.random.split(key)
        bound = 1.0 / jnp.sqrt(fan_in)
        w = jax.random.uniform(kw, (fan_out, fan_in), jnp.float32, -bound, bound)
        b = jax.random.uniform(kb, (fan_out,), jnp.float32, -bound, bound)
        return w, b

    k1, k2, k3 = jax.random.split(key, 3)
    w1, b1 = linear(k1, IN_FEATURES, H1)
    w2, b2 = linear(k2, H1, H2)
    w3, b3 = linear(k3, H2, OUT)
    return (w1, b1, w2, b2, w3, b3)


def reference_forward(x, params):
    w1, b1, w2, b2, w3, b3 = params
    h1 = jnp.maximum(x @ w1.T + b1, 0.0)
    h2 = jnp.maximum(h1 @ w2.T + b2, 0.0)
    z = h2 @ w3.T + b3
    return 1.0 / (1.0 + jnp.exp(-z))


if __name__ == "__main__":
    key = jax.random.PRNGKey(0)
    kx, kp = jax.random.split(key)
    batch = 300   # deliberately not tile-aligned: exercises the padded-tail path
    x = jax.random.normal(kx, (batch, IN_FEATURES), jnp.float32)
    params = init_params(kp)

    # tile=128 -> grid=(3,): multi-step parallel grid keeps both v7x TCs busy
    # even at this small demo batch; real workloads can use the 512 default.
    out = neural_net_forward(x, params, batch_tile=128)
    out = jax.block_until_ready(out)

    ref = reference_forward(x, params)
    assert out.shape == (batch, OUT)
    assert jnp.allclose(out, ref, atol=1e-5, rtol=1e-5)
    print("KERNEL_OK")
</pallas_src>

<mosaic_0001>
module attributes {stable_mosaic.version = 11 : i64} {
  func.func @mlp_kernel(%arg0: i32, %arg1: memref<32x128xf32, #tpu.memory_space<vmem>>, %arg2: memref<48x32xf32, #tpu.memory_space<vmem>>, %arg3: memref<48x1xf32, #tpu.memory_space<vmem>>, %arg4: memref<24x48xf32, #tpu.memory_space<vmem>>, %arg5: memref<24x1xf32, #tpu.memory_space<vmem>>, %arg6: memref<8x24xf32, #tpu.memory_space<vmem>>, %arg7: memref<8x1xf32, #tpu.memory_space<vmem>>, %arg8: memref<1x128xf32, #tpu.memory_space<vmem>>) attributes {dimension_semantics = [#tpu.dimension_semantics<parallel>], iteration_bounds = array<i64: 3>, scalar_prefetch = 0 : i64, scratch_operands = 0 : i64, tpu.core_type = #tpu.core_type<tc>, window_params = [{transform_indices = @transform_0, window_bounds = array<i64: 32, 128>}, {pipeline_mode = #tpu.pipeline_mode<synchronous>, transform_indices = @transform_1, window_bounds = array<i64: 48, 32>}, {pipeline_mode = #tpu.pipeline_mode<synchronous>, transform_indices = @transform_2, window_bounds = array<i64: 48, 1>}, {pipeline_mode = #tpu.pipeline_mode<synchronous>, transform_indices = @transform_3, window_bounds = array<i64: 24, 48>}, {pipeline_mode = #tpu.pipeline_mode<synchronous>, transform_indices = @transform_4, window_bounds = array<i64: 24, 1>}, {pipeline_mode = #tpu.pipeline_mode<synchronous>, transform_indices = @transform_5, window_bounds = array<i64: 8, 24>}, {pipeline_mode = #tpu.pipeline_mode<synchronous>, transform_indices = @transform_6, window_bounds = array<i64: 8, 1>}, {transform_indices = @transform_7, window_bounds = array<i64: 1, 128>}]} {
    %c0 = arith.constant 0 : index
    %c0_0 = arith.constant 0 : index
    %0 = vector.load %arg1[%c0, %c0_0] : memref<32x128xf32, #tpu.memory_space<vmem>>, vector<32x128xf32>
    %c0_1 = arith.constant 0 : index
    %c0_2 = arith.constant 0 : index
    %1 = vector.load %arg2[%c0_1, %c0_2] : memref<48x32xf32, #tpu.memory_space<vmem>>, vector<48x32xf32>
    %cst = arith.constant dense<0.000000e+00> : vector<48x128xf32>
    %2 = tpu.matmul %1, %0, %cst {dimension_numbers = #tpu.dot_dimension_numbers<[1], [0], [0], [1], [0, 0, 1, 1], [], []>} : vector<48x32xf32>, vector<32x128xf32>, vector<48x128xf32> -> vector<48x128xf32>
    %c0_3 = arith.constant 0 : index
    %c0_4 = arith.constant 0 : index
    %3 = vector.load %arg3[%c0_3, %c0_4] : memref<48x1xf32, #tpu.memory_space<vmem>>, vector<48x1xf32>
    %4 = vector.broadcast %3 : vector<48x1xf32> to vector<48x128xf32>
    %5 = arith.addf %2, %4 : vector<48x128xf32>
    %cst_5 = arith.constant 0.000000e+00 : f32
    %6 = vector.broadcast %cst_5 : f32 to vector<48x128xf32>
    %7 = arith.maximumf %5, %6 : vector<48x128xf32>
    %c0_6 = arith.constant 0 : index
    %c0_7 = arith.constant 0 : index
    %8 = vector.load %arg4[%c0_6, %c0_7] : memref<24x48xf32, #tpu.memory_space<vmem>>, vector<24x48xf32>
    %cst_8 = arith.constant dense<0.000000e+00> : vector<24x128xf32>
    %9 = tpu.matmul %8, %7, %cst_8 {dimension_numbers = #tpu.dot_dimension_numbers<[1], [0], [0], [1], [0, 0, 1, 1], [], []>} : vector<24x48xf32>, vector<48x128xf32>, vector<24x128xf32> -> vector<24x128xf32>
    %c0_9 = arith.constant 0 : index
    %c0_10 = arith.constant 0 : index
    %10 = vector.load %arg5[%c0_9, %c0_10] : memref<24x1xf32, #tpu.memory_space<vmem>>, vector<24x1xf32>
    %11 = vector.broadcast %10 : vector<24x1xf32> to vector<24x128xf32>
    %12 = arith.addf %9, %11 : vector<24x128xf32>
    %cst_11 = arith.constant 0.000000e+00 : f32
    %13 = vector.broadcast %cst_11 : f32 to vector<24x128xf32>
    %14 = arith.maximumf %12, %13 : vector<24x128xf32>
    %c0_12 = arith.constant 0 : index
    %c0_13 = arith.constant 0 : index
    %15 = vector.load %arg6[%c0_12, %c0_13] : memref<8x24xf32, #tpu.memory_space<vmem>>, vector<8x24xf32>
    %cst_14 = arith.constant dense<0.000000e+00> : vector<8x128xf32>
    %16 = tpu.matmul %15, %14, %cst_14 {dimension_numbers = #tpu.dot_dimension_numbers<[1], [0], [0], [1], [0, 0, 1, 1], [], []>} : vector<8x24xf32>, vector<24x128xf32>, vector<8x128xf32> -> vector<8x128xf32>
    %c0_15 = arith.constant 0 : index
    %c0_16 = arith.constant 0 : index
    %17 = vector.load %arg7[%c0_15, %c0_16] : memref<8x1xf32, #tpu.memory_space<vmem>>, vector<8x1xf32>
    %18 = vector.broadcast %17 : vector<8x1xf32> to vector<8x128xf32>
    %19 = arith.addf %16, %18 : vector<8x128xf32>
    %20 = vector.extract_strided_slice %19 {offsets = [0, 0], sizes = [1, 128], strides = [1, 1]} : vector<8x128xf32> to vector<1x128xf32>
    %cst_17 = arith.constant 0.000000e+00 : f32
    %21 = vector.broadcast %cst_17 : f32 to vector<1x128xf32>
    %22 = arith.subf %21, %20 : vector<1x128xf32>
    %23 = math.exp %22 : vector<1x128xf32>
    %cst_18 = arith.constant 1.000000e+00 : f32
    %24 = vector.broadcast %cst_18 : f32 to vector<1x128xf32>
    %25 = arith.addf %24, %23 : vector<1x128xf32>
    %cst_19 = arith.constant 1.000000e+00 : f32
    %26 = vector.broadcast %cst_19 : f32 to vector<1x128xf32>
    %27 = arith.divf %26, %25 : vector<1x128xf32>
    %c0_20 = arith.constant 0 : index
    %c0_21 = arith.constant 0 : index
    %28 = vector.load %arg8[%c0_20, %c0_21] : memref<1x128xf32, #tpu.memory_space<vmem>>, vector<1x128xf32>
    tpu.vector_store %arg8[%c0_20, %c0_21], %27 {strides = array<i32>} : memref<1x128xf32, #tpu.memory_space<vmem>>, vector<1x128xf32>,
    return
  }
  func.func @transform_0(%arg0: i32) -> (i32, i32) {
    %c0_i32 = arith.constant 0 : i32
    %c0_i32_0 = arith.constant 0 : i32
    return %c0_i32, %arg0 : i32, i32
  }
  func.func @transform_1(%arg0: i32) -> (i32, i32) {
    %c0_i32 = arith.constant 0 : i32
    %c0_i32_0 = arith.constant 0 : i32
    %c0_i32_1 = arith.constant 0 : i32
    return %c0_i32, %c0_i32_0 : i32, i32
  }
  func.func @transform_2(%arg0: i32) -> (i32, i32) {
    %c0_i32 = arith.constant 0 : i32
    %c0_i32_0 = arith.constant 0 : i32
    %c0_i32_1 = arith.constant 0 : i32
    return %c0_i32, %c0_i32_0 : i32, i32
  }
  func.func @transform_3(%arg0: i32) -> (i32, i32) {
    %c0_i32 = arith.constant 0 : i32
    %c0_i32_0 = arith.constant 0 : i32
    %c0_i32_1 = arith.constant 0 : i32
    return %c0_i32, %c0_i32_0 : i32, i32
  }
  func.func @transform_4(%arg0: i32) -> (i32, i32) {
    %c0_i32 = arith.constant 0 : i32
    %c0_i32_0 = arith.constant 0 : i32
    %c0_i32_1 = arith.constant 0 : i32
    return %c0_i32, %c0_i32_0 : i32, i32
  }
  func.func @transform_5(%arg0: i32) -> (i32, i32) {
    %c0_i32 = arith.constant 0 : i32
    %c0_i32_0 = arith.constant 0 : i32
    %c0_i32_1 = arith.constant 0 : i32
    return %c0_i32, %c0_i32_0 : i32, i32
  }
  func.func @transform_6(%arg0: i32) -> (i32, i32) {
    %c0_i32 = arith.constant 0 : i32
    %c0_i32_0 = arith.constant 0 : i32
    %c0_i32_1 = arith.constant 0 : i32
    return %c0_i32, %c0_i32_0 : i32, i32
  }
  func.func @transform_7(%arg0: i32) -> (i32, i32) {
    %c0_i32 = arith.constant 0 : i32
    %c0_i32_0 = arith.constant 0 : i32
    return %c0_i32, %arg0 : i32, i32
  }
}

</mosaic_0001>

<bundles_post_ra>
// kernel: tpu_custom_call.1
= control target key start
LH: loop header
LB: loop body
LE: loop exit
PB: predicated region body
PF: predicated region fallthrough
CT: control target
= control target key end

     0   :  { %12 = vsyncpa [#allocation4], 0  ;;  %s1209_s0 = inlined_call_operand.vmem [shape: f32[32,384], index: 0, kind: input, shape index: {}]   ;;  %s1210_s1 = inlined_call_operand.vmem [shape: f32[48,32], index: 1, kind: input, shape index: {}]   ;;  %s1211_s2 = inlined_call_operand.vmem [shape: f32[48,1], index: 2, kind: input, shape index: {}]   ;;  %s1212_s3 = inlined_call_operand.vmem [shape: f32[24,48], index: 3, kind: input, shape index: {}]   ;;  %s1213_s4 = inlined_call_operand.vmem [shape: f32[24,1], index: 4, kind: input, shape index: {}]   ;;  %s1214_s5 = inlined_call_operand.vmem [shape: f32[8,24], index: 5, kind: input, shape index: {}]   ;;  %s1215_s6 = inlined_call_operand.vmem [shape: f32[8,1], index: 6, kind: input, shape index: {}]   ;;  %s1216_s7 = inlined_call_operand.hbm [shape: f32[1,384], index: 7, kind: output, shape index: {}]  }
   0x1   :  { %14 = vsyncpa [#allocation4 + $0x1], 0  ;;  %s1032_s24 = smov 0   ;;  %s1034_s25 = smov 0  }
   0x2   :  { %s1036_s26 = smov 0   ;;  %s1038_s27 = smov 0  }
   0x3 LB: > { %s763_s28 = sadd.s32 4294967295, %s985_s27   ;;  %s764_s29 = sadd.s32 4294967294, %s985_s27   ;;  %s985_s27 = sphi %s1038_s27, %s1222_s27   ;;  %s981_s26 = sphi %s1036_s26, %s1221_s26   ;;  %s977_s25 = sphi %s1034_s25, %s1220_s25   ;;  %s973_s24 = sphi %s1032_s24, %s1219_s24  }
   0x4   : > { %s1055_s30 = sadd.s32 1, %s985_s27   ;;  %s27_s8 = sadd.s32 1, %s981_s26 }
   0x5   : > { %s24_s9 = ssub.s32 %s985_s27, %s1055_s30  ;;  %p34_p0 = scmp.ne.s32.totalorder %s981_s26, %s977_s25 }
   0x6   : > { %p25_p1 = scmp.eq.s32.totalorder %s24_s9, 0  ;;  %p35_p2 = scmp.eq.s32.totalorder %s985_s27, 0 }
   0x7   : > { %p190_p3 = scmp.eq.s32.totalorder %s763_s28, 2  ;;  %p195_p4 = scmp.ne.s32.totalorder %s977_s25, %s973_s24 }
   0x8   : > { %s1068_s10 = scalar_select %p25_p1, %s981_s26, %s27_s8  }
   0x9   : > { %p36_p5 = por %p35_p2, %p34_p0  ;;  %p1070_p6 = por %p190_p3, %p34_p0 }
   0xa   : > { %p196_p7 = scmp.eq.s32.totalorder %s764_s29, 2  ;;  %p766_p9 = scmp.ge.s32.totalorder %s985_s27, 3 }
   0xc   : > { %p1074_p8 = por %p196_p7, %p195_p4  ;;  %230 = sbr.rel (%p766_p9) target bundleno = 26 (0x1a), region = 40 }
  0x13   : > { %233 = sbr.rel (!%p36_p5) target bundleno = 26 (0x1a), region = 44  ;;  %s235_s13 = sand.u32 (%p36_p5), 1, %s981_s26  }
  0x14   : > { %s768_s14 = sshll.u32 (%p36_p5), %s985_s27, 3  ;;  %s767_s15 = sshll.u32 (%p36_p5), %s235_s13, 5 }
  0x15   : > { %s239_s18 = scalar_lea.vmem (%p36_p5), %s1209_s0, %s768_s14  ;;  %s237_s19 = scalar_lea.vmem (%p36_p5), [#allocation2], %s767_s15 }
  0x16   : > { %v273_v0 = vld [vmem:[%s239_s18] sm:$0xff] (%p36_p5)  ;;  %v275_v1 = vld [vmem:[%s239_s18 + $0x18] sm:$0xff] (%p36_p5)  ;;  %v277_v2 = vld [vmem:[%s239_s18 + $0x30] sm:$0xff] (%p36_p5) }
  0x17   : > { %274 = vst [vmem:[%s237_s19] sm:$0xff] (%p36_p5), %v273_v0  ;;  %276 = vst [vmem:[%s237_s19 + $0x8] sm:$0xff] (%p36_p5), %v275_v1  ;;  %v279_v3 = vld [vmem:[%s239_s18 + $0x48] sm:$0xff] (%p36_p5) }
  0x18   : > { %278 = vst [vmem:[%s237_s19 + $0x10] sm:$0xff] (%p36_p5), %v277_v2  ;;  %280 = vst [vmem:[%s237_s19 + $0x18] sm:$0xff] (%p36_p5), %v279_v3 }
  0x1a PF: > { %p769_p10 = scmp.ge.s32.totalorder %s985_s27, 1  ;;  %p285_p11 = scmp.lt.s32.totalorder %s985_s27, 4 }
  0x1c   : > { %p286_p12 = pnand %p769_p10, %p285_p11 }
  0x1d   : > { %s1087_s20 = sand.u32 (!%p286_p12), 1, %s977_s25   ;;  %v326_v4 = vld [vmem:[%s1210_s1] sm:$0xff] (!%p286_p12)  ;;  %vm368_vm0 = vcmask (!%p286_p12), 261120   ;;  %v987_v5 = vmov (!%p286_p12), 0   ;;  %v334_v7 = vld [vmem:[%s1211_s2 + $0x10] sm:$0xff] (!%p286_p12)  ;;  %v333_v13 = vld [vmem:[%s1211_s2 + $0x8] sm:$0xff] (!%p286_p12) }
  0x1e   : > { %289 = sbr.rel (%p286_p12) target bundleno = 756 (0x2f4), region = 82  ;;  %s770_s23 = sshll.u32 (!%p286_p12), %s1087_s20, 5  ;;  %815 = vmatprep.mubr.msk.f32.mxu0 (!%p286_p12), %vm368_vm0, %v326_v4  ;;  %917 = vset.pattern.permute.xlu0 (!%p286_p12), %v987_v5  ;;  %v332_v6 = vld [vmem:[%s1211_s2] sm:$0xff] (!%p286_p12)  ;;  %v335_v15 = vld [vmem:[%s1211_s2 + $0x18] sm:$0xff] (!%p286_p12)  ;;  %v337_v17 = vld [vmem:[%s1211_s2 + $0x28] sm:$0xff] (!%p286_p12)  ;;  %v988_v27 = vmov (!%p286_p12), 0.0|0.0  }
  0x1f   : > { %918 = vset.pattern.permute.xlu1 (!%p286_p12), %v987_v5  ;;  %s294_s14 = scalar_lea.vmem (!%p286_p12), [#allocation2], %s770_s23  ;;  %340 = vperm.xlu0 (!%p286_p12), %917, %v332_v6   ;;  %v336_v16 = vld [vmem:[%s1211_s2 + $0x20] sm:$0xff] (!%p286_p12)  ;;  %v327_v18 = vld [vmem:[%s1210_s1 + $0x8] sm:$0xff] (!%p286_p12)  ;;  %v328_v19 = vld [vmem:[%s1210_s1 + $0x10] sm:$0xff] (!%p286_p12)  ;;  %vm989_vm1 = vmmov (!%p286_p12), 0   ;;  %v990_v28 = vmov (!%p286_p12), 0.0  }
  0x20   : > { %v322_v8 = vld [vmem:[%s294_s14] sm:$0xff] (!%p286_p12)  ;;  %v323_v9 = vld [vmem:[%s294_s14 + $0x8] sm:$0xff] (!%p286_p12)  ;;  %v324_v10 = vld [vmem:[%s294_s14 + $0x10] sm:$0xff] (!%p286_p12)  ;;  %350 = vperm.xlu1 (!%p286_p12), %918, %v334_v7   ;;  %862 = vmatprep.subr.bf16.mxu1 (!%p286_p12), %v988_v27  ;;  %vm509_vm2 = vcmask (!%p286_p12), 392192   ;;  %vm609_vm3 = vcmask (!%p286_p12), 195584   ;;  %s781_s29 = sshll.u32 (!%p286_p12), %s763_s28, 4 }
  0x21   : > { %v854_v11 = vpack.c.bf16 (!%p286_p12), %v323_v9, %v322_v8  ;;  %v325_v12 = vld [vmem:[%s294_s14 + $0x18] sm:$0xff] (!%p286_p12)  ;;  %v491_v20 = vld [vmem:[%s1213_s4] sm:$0xff] (!%p286_p12)  ;;  %v492_v21 = vld [vmem:[%s1213_s4 + $0x8] sm:$0xff] (!%p286_p12)  ;;  %836 = vmatprep.mubr.msk.f32.mxu1 (!%p286_p12), %vm989_vm1, %v990_v28  ;;  %s321_s8 = scalar_lea.vmem (!%p286_p12), [#allocation3], %s1087_s20  ;;  %s1166_s15 = scalar_lea.hbm (!%p286_p12), %s1216_s7, %s781_s29 }
  0x22   : > { %v858_v14 = vpack.c.bf16 (!%p286_p12), %v325_v12, %v324_v10  ;;  %v329_v22 = vld [vmem:[%s1210_s1 + $0x18] sm:$0xff] (!%p286_p12)  ;;  %v330_v23 = vld [vmem:[%s1210_s1 + $0x20] sm:$0xff] (!%p286_p12)  ;;  %v493_v24 = vld [vmem:[%s1213_s4 + $0x10] sm:$0xff] (!%p286_p12)  ;;  %s703_s9 = sshll.u32 (!%p286_p12), %s321_s8, 4  ;;  %s691_s16 = scalar_lea.sflag (!%p286_p12), [#allocation4], %s1087_s20  ;;  %s1168_s9 = int_to_ptr.vmem [resolvable:$true] %s703_s9 }
  0x23   : > { %855 = vmatprep.subr.bf16.mxu0 (!%p286_p12), %v854_v11  ;;  %345 = vperm.xlu0 (!%p286_p12), %917, %v333_v13   ;;  %v603_v25 = vld [vmem:[%s1215_s6] sm:$0xff] (!%p286_p12)  ;;  %v331_v26 = vld [vmem:[%s1210_s1 + $0x28] sm:$0xff] (!%p286_p12)  ;;  %v490_v58 = vld [vmem:[%s1212_s3 + $0x10] sm:$0xff] (!%p286_p12)  ;;  %s923_s17 = scalar_lea.vmem (!%p286_p12), %s1168_s9, 16  ;;  %s991_s28 = smov (!%p286_p12), [#allocation3]  }
  0x24   : > { %857 = vmatpush3.bf16.msra.mxu0 (!%p286_p12), %v854_v11  ;;  %355 = vperm.xlu1 (!%p286_p12), %918, %v335_v15   ;;  %v488_v56 = vld [vmem:[%s1212_s3] sm:$0xff] (!%p286_p12)  ;;  %v489_v57 = vld [vmem:[%s1212_s3 + $0x8] sm:$0xff] (!%p286_p12)  ;;  %p924_p13 = scmp.ne.s32.totalorder (!%p286_p12), %s1168_s9, %s923_s17  ;;  %s927_s18 = sshll.u32 (!%p286_p12), %s991_s28, 4  ;;  %s928_s18 = int_to_ptr.vmem [resolvable:$false] %s927_s18 }
  0x25   : > { %859 = vmatprep.subr.bf16.mxu0 %v858_v14  ;;  %v602_v11 = vld [vmem:[%s1214_s5] sm:$0xff]  ;;  %s929_s19 = scalar_lea.vmem %s928_s18, 32  ;;  %p930_p2 = scmp.lt.s32.totalorder %s1168_s9, %s928_s18 }
  0x26   : > { %p925_p0 = pnand %p924_p13, %p1070_p6  ;;  %p931_p3 = scmp.lt.s32.totalorder %s929_s19, %s923_s17 }
  0x27   : > { %360 = vperm.xlu0 %917, %v336_v16  }
  0x28   : > { %861 = vmatpush3.bf16.msra.mxu0 %v858_v14  ;;  %365 = vperm.xlu1 %918, %v337_v17   ;;  %p926_p1 = pneg %p925_p0  ;;  %p932_p4 = por %p931_p3, %p930_p2 }
  0x29   : > { %871 = vmatprep.subr.bf16.mxu0 %v988_v27 }
  0x2a   : > { %p933_p5 = pnand %p932_p4, %p926_p1 }
  0x2b   : > { %816 = vmatmul.mubr.msk.f32.vlgmr.msra.gmra.mrb[0].mxu0 %vm368_vm0, %v327_v18  ;;  %496 = vperm.xlu0 %917, %v491_v20  }
  0x2c   : > { %818 = vmatprep.mubr.msk.f32.mxu0 %vm368_vm0, %v328_v19  ;;  %501 = vperm.xlu1 %918, %v492_v21  }
  0x2f   : > { %819 = vmatmul.mubr.msk.f32.gmra.mrb[2].mxu0 %vm368_vm0, %v329_v22  ;;  %506 = vperm.xlu0 %917, %v493_v24  }
  0x30   : > { %821 = vmatprep.mubr.msk.f32.mxu0 %vm368_vm0, %v330_v23  ;;  %606 = vperm.xlu1 %918, %v603_v25  }
  0x33   : > { %822 = vmatmul.mubr.msk.f32.gmra.mrb[4].mxu0 %vm368_vm0, %v331_v26 }
  0x34   : > { %851 = vmatprep.mubr.msk.f32.mxu0 %vm989_vm1, %v990_v28 }
  0x9e   : > { %v341_v29 = vpop.permute.xlu0 %340 }
  0x9f   : > { %v351_v30 = vpop.permute.xlu1 %350 }
  0xa2   : > { %v346_v31 = vpop.permute.xlu0 %345 }
  0xa3   : > { %v356_v35 = vpop.permute.xlu1 %355 }
  0xa6   : > { %v361_v48 = vpop.permute.xlu0 %360 }
  0xa7   : > { %v366_v45 = vpop.permute.xlu1 %365 }
  0xaa   : > { %v497_v61 = vpop.permute.xlu0 %496 }
  0xab   : > { %v502_v63 = vpop.permute.xlu1 %501 }
  0xae   : > { %v507_v5 = vpop.permute.xlu0 %506 }
  0xaf   : > { %v607_v12 = vpop.permute.xlu1 %606 }
  0xfe   : > { %v817_v32 = vpop.f32.mrb[0].mxu0 }
  0xff   : > { %v459_v33 = vadd.f32 %v817_v32, %v346_v31  ;;  %v453_v34 = vpop.f32.mrb[1].mxu0 }
 0x100   : > { %v454_v36 = vadd.f32 %v453_v34, %v341_v29 }
 0x101   : > { %v483_v37 = vmax.f32 %v459_v33, 0.0 }
 0x102   : > { %v482_v38 = vmax.f32 %v454_v36, 0.0  ;;  %v820_v39 = vpop.f32.mrb[2].mxu0 }
 0x103   : > { %v469_v40 = vadd.f32 %v820_v39, %v356_v35  ;;  %v463_v41 = vpop.f32.mrb[3].mxu0 }
 0x104   : > { %v464_v42 = vadd.f32 %v463_v41, %v351_v30  ;;  %v863_v43 = vpack.c.bf16 %v483_v37, %v482_v38 }
 0x105   : > { %v485_v44 = vmax.f32 %v469_v40, 0.0 }
 0x106   : > { %v484_v46 = vmax.f32 %v464_v42, 0.0  ;;  %v823_v47 = vpop.f32.mrb[4].mxu0  ;;  %864 = vmatpush3.bf16.msra.mxu1 %v863_v43 }
 0x107   : > { %v479_v49 = vadd.f32 %v823_v47, %v366_v45  ;;  %v473_v50 = vpop.f32.mrb[5].mxu0  ;;  %865 = vmatprep.subr.bf16.mxu1 %v988_v27 }
 0x108   : > { %v866_v51 = vpack.c.bf16 %v485_v44, %v484_v46  ;;  %v474_v52 = vadd.f32 %v473_v50, %v361_v48 }
 0x109   : > { %v487_v53 = vmax.f32 %v479_v49, 0.0 }
 0x10a   : > { %v486_v54 = vmax.f32 %v474_v52, 0.0  ;;  %867 = vmatpush3.bf16.msra.mxu1 %v866_v51 }
 0x10b   : > { %868 = vmatprep.subr.bf16.mxu1 %v988_v27 }
 0x10c   : > { %v869_v55 = vpack.c.bf16 %v487_v53, %v486_v54 }
 0x10e   : > { %870 = vmatpush3.bf16.msra.mxu1 %v869_v55 }
 0x111   : > { %837 = vmatmul.mubr.msk.f32.vlgmr.msra.gmra.mrb[0].mxu1 %vm509_vm2, %v488_v56 }
 0x112   : > { %839 = vmatprep.mubr.msk.f32.mxu1 %vm989_vm1, %v990_v28 }
 0x115   : > { %840 = vmatmul.mubr.msk.f32.gmra.mrb[2].mxu1 %vm509_vm2, %v489_v57 }
 0x116   : > { %842 = vmatprep.mubr.msk.f32.mxu1 %vm989_vm1, %v990_v28 }
 0x119   : > { %843 = vmatmul.mubr.msk.f32.gmra.mrb[4].mxu1 %vm509_vm2, %v490_v58 }
 0x1e4   : > { %v585_v59 = vpop.f32.mrb[0].mxu1 }
 0x1e5   : > { %v838_v60 = vpop.f32.mrb[1].mxu1  ;;  %v586_v62 = vadd.f32 %v585_v59, %v497_v61 }
 0x1e7   : > { %v599_v3 = vmax.f32 %v586_v62, 0.0 }
 0x1e8   : > { %v590_v0 = vpop.f32.mrb[2].mxu1 }
 0x1e9   : > { %v591_v1 = vadd.f32 %v590_v0, %v502_v63  ;;  %v841_v2 = vpop.f32.mrb[3].mxu1 }
 0x1eb   : > { %v600_v4 = vmax.f32 %v591_v1, 0.0 }
 0x1ec   : > { %v595_v6 = vpop.f32.mrb[4].mxu1 }
 0x1ed   : > { %v872_v7 = vpack.c.bf16 %v600_v4, %v599_v3  ;;  %v596_v8 = vadd.f32 %v595_v6, %v507_v5  ;;  %v844_v9 = vpop.f32.mrb[5].mxu1 }
 0x1ef   : > { %873 = vmatpush3.bf16.msra.mxu0 %v872_v7  ;;  %v601_v10 = vmax.f32 %v596_v8, 0.0 }
 0x1f0   : > { %849 = vmatprep.subr.mxu0 %v990_v28 }
 0x1f3   : > { %850 = vmatpush3.msra.mxu0 %v601_v10 }
 0x1f4   : > { %852 = vmatmul.mubr.msk.f32.vlgmr.msra.gmra.mrb[6].mxu0 %vm609_vm3, %v602_v11 }
 0x2c7   : > { %v679_v13 = vpop.f32.mrb[6].mxu0 }
 0x2c8   : > { %v680_v14 = vadd.f32 %v679_v13, %v607_v12  ;;  %v853_v15 = vpop.f32.mrb[7].mxu0 }
 0x2ca   : > { %v683_v16 = vsub.f32 0.0, %v680_v14 }
 0x2cc   : > { %v684_v17 = vmul.f32 1.442695, %v683_v16 }
 0x2ce   : > { %919 = vpow2.f32 %v684_v17 }
 0x2d8   : > { %v920_v18 = vpop.eup %919 }
 0x2d9   : > { %v686_v19 = vadd.f32 1.0, %v920_v18 }
 0x2db   : > { %921 = vrcp.f32 %v686_v19 }
 0x2e5   : > { %v922_v20 = vpop.eup %921 }
 0x2e6   : > { %689 = vst [vmem:[%s321_s8] sm:$0x1] %v922_v20 }
 0x2e7   : > { %936 = shalt.err (!%p933_p5)
}
 0x2e8   : > { %s937_s20 = scalar_lea.hbm %s1166_s15, 16  ;;  %s941_s23 = scalar_lea.hbm %s1216_s7, 48 }
 0x2e9   : > { %p938_p7 = scmp.ne.s32.totalorder %s1166_s15, %s937_s20  ;;  %p942_p11 = scmp.lt.u32.totalorder %s1166_s15, %s1216_s7 }
 0x2ea   : > { %p943_p12 = scmp.lt.u32.totalorder %s941_s23, %s937_s20  ;;  %p945_p0 = scmp.lt.u32.totalorder %s937_s20, %s1166_s15 }
 0x2eb   : > { %p939_p9 = pnand %p938_p7, %p1070_p6 }
 0x2ec   : > { %p944_p13 = por %p943_p12, %p942_p11 }
 0x2ed   : > { %p940_p10 = pneg %p939_p9 }
 0x2ee   : > { %p946_p1 = por %p945_p0, %p944_p13 }
 0x2f0   : > { %p947_p2 = pnand %p946_p1, %p940_p10 }
 0x2f2   : > { %950 = shalt.err (!%p947_p2)
}
 0x2f3   : > { %874 = dma.vmem_to_hbm [thread:$0]  (%p1070_p6), %s1168_s9, 16, %s1166_s15, %s691_s16  }
 0x2f4 PF: > { %p880_p3 = scmp.ge.s32.totalorder %s985_s27, 2  ;;  %s715_s13 = sand.u32 1, %s973_s24  }
 0x2f5   : > { %s716_s14 = scalar_lea.sflag [#allocation4], %s715_s13 }
 0x2f6   : > { %p877_p4 = pnand %p880_p3, %p1074_p8 }
 0x2f8   : > { %968 = dma.done.wait (!%p877_p4), %s716_s14, 16  }
 0x2f9   : > { %970 = vsyncadd (!%p877_p4), %s716_s14, 4294967280  ;;  %p17_p5 = scmp.ge.s32.totalorder %s1055_s30, 5   ;;  %s1219_s24 = smov %s977_s25 }
 0x2fa   : > { %s1220_s25 = smov %s981_s26  ;;  %s1221_s26 = smov %s1068_s10 }
 0x2fb   : > { %s1222_s27 = smov %s1055_s30  ;;  %19 = sbr.rel (!%p17_p5) target bundleno = 3 (0x3), region = 126 }
 0x302   :  { %720 = vsyncpa [#allocation4], 1 }
 0x303   :  { %722 = vsyncpa [#allocation4 + $0x1], 1 }

</bundles_post_ra>
